<compile_context>
chip_gen: v7x
topology: tpu7x:2x2x1
jax: 0.10.0
libtpu: 0.0.40
codegen_flags: <defaults>
</compile_context>

<pallas_src>
import warnings

import numpy as np
import jax
import jax.numpy as jnp
from jax.experimental import pallas as pl
from jax.experimental.pallas import tpu as pltpu

# Donation of the top-level input is what lets XLA realize the alias; if the
# runtime ever declines it we still run correctly, so silence that one warning.
warnings.filterwarnings("ignore", message="Some donated buffers were not usable")


def _identity_kernel(x_ref, o_ref):
    # Trivial pass-through (the "body" of an empty forward).
    o_ref[...] = x_ref[...]


_SINGLE_BLOCK_MAX_BYTES = 4 << 20   # grid-less whole-array fast path
_VMEM_LIMIT_BYTES = 32 << 20        # safe on v5e / v6e / v7x
_ROW_ALIGN = 32                     # sublane-safe for f32 / bf16 / int8
_LANE = 128                         # lane dimension (last dim)


def _tile_cap_bytes() -> int:
    """Per-buffer tile cap, generation-aware (v7x has only 64 MiB VMEM/TC)."""
    try:
        kind = jax.devices()[0].device_kind.lower()
    except Exception:
        kind = ""
    if "v7" in kind:
        return 6 << 20   # 4 double-buffered copies ≈ 24 MiB < 32 MiB scoped
    return 8 << 20       # v5e/v6e: 4 buffers = 32 MiB, matches vmem limit


def _choose_tiles(rows: int, cols: int, itemsize: int, cap_bytes: int):
    """Largest tile under cap; rows multiple of 32, cols multiple of 128
    (or full extent), so tiles stay sublane-aligned and lane-dense."""
    bytes_per_row = cols * itemsize

    if rows <= _ROW_ALIGN:
        tile_rows = rows                                  # full extent: legal
    elif _ROW_ALIGN * bytes_per_row <= cap_bytes:
        tile_rows = min(rows,
                        (cap_bytes // bytes_per_row) // _ROW_ALIGN * _ROW_ALIGN)
    else:
        tile_rows = _ROW_ALIGN                            # must also tile cols

    if tile_rows * bytes_per_row <= cap_bytes or cols <= _LANE:
        tile_cols = cols                                  # keep full lane width
    else:
        max_cols = (cap_bytes // (tile_rows * itemsize)) // _LANE * _LANE
        tile_cols = max(_LANE, min(cols, max_cols))

    return tile_rows, tile_cols


def _identity_inplace(x: jax.Array) -> jax.Array:
    """Identity copy through VMEM, output aliased onto the input buffer."""
    assert x.ndim == 2, "plumbing identity expects a 2-D array"
    rows, cols = x.shape
    itemsize = x.dtype.itemsize
    nbytes = rows * cols * itemsize

    if nbytes <= _SINGLE_BLOCK_MAX_BYTES:
        # Single block, no grid: whole array in VMEM for one invocation.
        return pl.pallas_call(
            _identity_kernel,
            out_shape=jax.ShapeDtypeStruct(x.shape, x.dtype),
            input_output_aliases={0: 0},
            compiler_params=pltpu.CompilerParams(
                vmem_limit_bytes=_VMEM_LIMIT_BYTES),
        )(x)

    tile_rows, tile_cols = _choose_tiles(rows, cols, itemsize, _tile_cap_bytes())
    grid = (pl.cdiv(rows, tile_rows), pl.cdiv(cols, tile_cols))

    return pl.pallas_call(
        _identity_kernel,
        out_shape=jax.ShapeDtypeStruct(x.shape, x.dtype),
        grid=grid,
        in_specs=[pl.BlockSpec((tile_rows, tile_cols), lambda i, j: (i, j))],
        out_specs=pl.BlockSpec((tile_rows, tile_cols), lambda i, j: (i, j)),
        input_output_aliases={0: 0},
        compiler_params=pltpu.CompilerParams(
            dimension_semantics=("parallel", "parallel"),
            vmem_limit_bytes=_VMEM_LIMIT_BYTES,
        ),
    )(x)


# Donate the input so the aliased output truly reuses the same HBM buffer.
_run_identity = jax.jit(_identity_inplace, donate_argnums=0)


class CVAERegressPointPallas:
    """JAX/Pallas port of models.pointnet_cvae_models.CVAERegressPoint."""

    def __init__(self):
        # Reference __init__ defines no parameters.
        pass

    def forward(self):
        # TODO(synk): reference forward() body is `pass` (no inputs, returns
        # None) — there is no compute to translate; exact semantics preserved.
        return None

    __call__ = forward


if __name__ == "__main__":
    # Exact-semantics check: forward() takes no inputs and returns None.
    model = CVAERegressPointPallas()
    assert model() is None

    key = jax.random.PRNGKey(0)
    k_small, k_big, k_bf16 = jax.random.split(key, 3)

    # Small → single-block (grid-less, aliased) path.
    x_small = jax.random.normal(k_small, (16, 128), dtype=jnp.float32)
    ref_small = np.asarray(x_small)                  # host copy pre-donation
    y_small = _run_identity(x_small)
    jax.block_until_ready(y_small)
    assert np.allclose(np.asarray(y_small), ref_small), "identity mismatch (small)"

    # Larger f32 → tiled, cdiv path (multi-tile on all generations).
    x_big = jax.random.normal(k_big, (4096, 1024), dtype=jnp.float32)  # 16 MiB
    ref_big = np.asarray(x_big)
    y_big = _run_identity(x_big)
    jax.block_until_ready(y_big)
    assert np.allclose(np.asarray(y_big), ref_big), "identity mismatch (tiled f32)"

    # bf16 → exercises the 32-row sublane-safe tiling on the tiled path.
    x_bf = jax.random.normal(k_bf16, (4096, 640), dtype=jnp.bfloat16)  # 5 MiB
    ref_bf = np.asarray(x_bf.astype(jnp.float32))
    y_bf = _run_identity(x_bf)
    jax.block_until_ready(y_bf)
    assert np.array_equal(np.asarray(y_bf.astype(jnp.float32)), ref_bf), \
        "identity mismatch (tiled bf16)"

    print("KERNEL_OK")
</pallas_src>

<mosaic_0001>
module attributes {stable_mosaic.version = 11 : i64} {
  func.func @_identity_kernel(%arg0: memref<16x128xf32, #tpu.memory_space<vmem>>, %arg1: memref<16x128xf32, #tpu.memory_space<vmem>>) attributes {dimension_semantics = [], scalar_prefetch = 0 : i64, scratch_operands = 0 : i64, tpu.core_type = #tpu.core_type<tc>} {
    %c0 = arith.constant 0 : index
    %c0_0 = arith.constant 0 : index
    %0 = vector.load %arg0[%c0, %c0_0] : memref<16x128xf32, #tpu.memory_space<vmem>>, vector<16x128xf32>
    %c0_1 = arith.constant 0 : index
    %c0_2 = arith.constant 0 : index
    %1 = vector.load %arg1[%c0_1, %c0_2] : memref<16x128xf32, #tpu.memory_space<vmem>>, vector<16x128xf32>
    tpu.vector_store %arg1[%c0_1, %c0_2], %0 {strides = array<i32>} : memref<16x128xf32, #tpu.memory_space<vmem>>, vector<16x128xf32>,
    return
  }
}

</mosaic_0001>

<bundles_post_ra>
// kernel: _identity_inplace.1
= control target key start
LH: loop header
LB: loop body
LE: loop exit
PB: predicated region body
PF: predicated region fallthrough
CT: control target
= control target key end

     0   :  { %6 = vsyncpa [#allocation3], 0  ;;  %s134_s0 = inlined_call_operand.hbm [shape: f32[16,128], index: 0, kind: input, shape index: {}, may-alias: {0,1}]   ;;  %s135_s1 = inlined_call_operand.hbm [shape: f32[16,128], index: 1, kind: output, shape index: {}, may-alias: {0,1}]  }
   0x1   :  { %7 = vsyncpa [#allocation4], 0  ;;  %s96_s6 = smov [#allocation2]   ;;  %s48_s10 = scalar_lea.hbm %s134_s0, 256 }
   0x2   :  { %s13_s7 = sshll.u32 %s96_s6, 4  ;;  %p49_p0 = scmp.ne.s32.totalorder %s134_s0, %s48_s10  ;;  %s14_s7 = int_to_ptr.vmem [resolvable:$true] %s13_s7 }
   0x3   :  { %p52_p1 = scmp.lt.u32.totalorder %s48_s10, %s134_s0 }
   0x5   :  { %p54_p2 = pnand %p52_p1, %p49_p0 }
   0x7   :  { %57 = shalt.err (!%p54_p2)
}
   0x8   :  { %s58_s15 = scalar_lea.vmem %s14_s7, 256  ;;  %p63_p4 = scmp.lt.s32.totalorder %s14_s7, %s14_s7 }
   0x9   :  { %p59_p3 = scmp.ne.s32.totalorder %s14_s7, %s58_s15  ;;  %p64_p5 = scmp.lt.s32.totalorder %s58_s15, %s58_s15 }
   0xb   :  { %p65_p6 = por %p64_p5, %p63_p4 }
   0xd   :  { %p66_p7 = pnand %p65_p6, %p59_p3 }
   0xf   :  { %69 = shalt.err (!%p66_p7)
}
  0x10   :  { %s97_s16 = smov 128   ;;  %s98_s17 = smov 8  }
  0x11   :  { %19 = dma.hbm_to_vmem [thread:$0]  %s134_s0, 256, %s14_s7, [#allocation3], %s97_s16, %s97_s16, %s98_s17  }
  0x12   :  { %92 = dma.done.wait [#allocation3], 256  }
  0x13   :  { %93 = vsyncadd [#allocation3], 4294967040  ;;  %s99_s20 = smov [#allocation5]   ;;  %v23_v0 = vld [vmem:[#allocation2] sm:$0xff]  ;;  %v24_v1 = vld [vmem:[#allocation2 + $0x8] sm:$0xff] }
  0x14   :  { %s32_s21 = sshll.u32 %s99_s20, 4  ;;  %25 = vst [vmem:[#allocation5] sm:$0xff] %v23_v0  ;;  %26 = vst [vmem:[#allocation5 + $0x8] sm:$0xff] %v24_v1  ;;  %s33_s21 = int_to_ptr.vmem [resolvable:$true] %s32_s21 }
  0x15   :  { %s70_s22 = scalar_lea.vmem %s33_s21, 256  ;;  %p75_p9 = scmp.lt.s32.totalorder %s33_s21, %s33_s21 }
  0x16   :  { %p71_p8 = scmp.ne.s32.totalorder %s33_s21, %s70_s22  ;;  %p76_p10 = scmp.lt.s32.totalorder %s70_s22, %s70_s22 }
  0x18   :  { %p77_p11 = por %p76_p10, %p75_p9 }
  0x1a   :  { %p78_p12 = pnand %p77_p11, %p71_p8 }
  0x1c   :  { %81 = shalt.err (!%p78_p12)
}
  0x1d   :  { %s82_s0 = scalar_lea.hbm %s135_s1, 256 }
  0x1e   :  { %p83_p13 = scmp.ne.s32.totalorder %s135_s1, %s82_s0  ;;  %p86_p0 = scmp.lt.u32.totalorder %s82_s0, %s135_s1 }
  0x20   :  { %p88_p1 = pnand %p86_p0, %p83_p13 }
  0x22   :  { %91 = shalt.err (!%p88_p1)
}
  0x23   :  { %38 = dma.vmem_to_hbm [thread:$0]  %s33_s21, 256, %s135_s1, [#allocation4], %s97_s16, %s97_s16, %s98_s17  }
  0x24   :  { %94 = dma.done.wait [#allocation4], 256  }
  0x25   :  { %95 = vsyncadd [#allocation4], 4294967040 }
  0x26   :  { %42 = vsyncpa [#allocation3], 1 }
  0x27   :  { %43 = vsyncpa [#allocation4], 1 }

</bundles_post_ra>
